<compile_context>
chip_gen: v7x
topology: tpu7x:2x2x1
jax: 0.10.0
libtpu: 0.0.40
codegen_flags: <defaults>
</compile_context>

<pallas_src>
import jax
import jax.numpy as jnp
from jax.experimental import pallas as pl
from jax.experimental.pallas import tpu as pltpu

_LANE = 128
_SUBLANE = 8


def _round_up(x, m):
    return (x + m - 1) // m * m


def _cdiv(a, b):
    return (a + b - 1) // b


# ---------------------------------------------------------------------------
# Kernels
# ---------------------------------------------------------------------------

def _fused_kernel(x_ref, w_ref, b_ref, wo_ref, bo_ref, o_ref):
    """All layers fused into one grid step; weights are VMEM-resident.

    x_ref : [TB, Hp]       bf16 input activation tile
    w_ref : [L, Hp, Hp]    bf16 hidden-layer weights (in x out), resident
    b_ref : [L, 1, Hp]     f32 hidden-layer biases, resident
    wo_ref: [Hp, Op]       bf16 output weight (in x out), resident
    bo_ref: [1, Op]        f32 output bias, resident
    o_ref : [TB, Op]       output tile
    """
    h = x_ref[...]                                   # bf16 [TB, Hp]
    n_layer = w_ref.shape[0]
    # Static Python loop == fully unrolled straight-line code (n_layer is small
    # and static), equivalent to lax.fori_loop(..., unroll=True) here.
    for l in range(n_layer):
        acc = jnp.dot(h, w_ref[l], preferred_element_type=jnp.float32)
        h = jnp.maximum(acc + b_ref[l], 0.0).astype(h.dtype)
    # dropout == identity (inference), then the output Linear.
    out = jnp.dot(h, wo_ref[...], preferred_element_type=jnp.float32)
    o_ref[...] = (out + bo_ref[...]).astype(o_ref.dtype)


def _streamed_kernel(x_ref, w_ref, b_ref, wo_ref, bo_ref, o_ref, h_ref):
    """Fallback: one (batch tile, layer) pair per grid step.

    Layer weights are streamed (double-buffered) from HBM; the activation is
    carried across layer steps in a bf16 VMEM scratch.  Layer 0 reads directly
    from x_ref (no copy into scratch).
    """
    layer = pl.program_id(1)

    @pl.when(layer == 0)
    def _first():
        acc = jnp.dot(x_ref[...], w_ref[...], preferred_element_type=jnp.float32)
        h_ref[...] = jnp.maximum(acc + b_ref[...], 0.0).astype(h_ref.dtype)

    @pl.when(layer > 0)
    def _rest():
        acc = jnp.dot(h_ref[...], w_ref[...], preferred_element_type=jnp.float32)
        h_ref[...] = jnp.maximum(acc + b_ref[...], 0.0).astype(h_ref.dtype)

    @pl.when(layer == pl.num_programs(1) - 1)
    def _finalize():
        out = jnp.dot(h_ref[...], wo_ref[...], preferred_element_type=jnp.float32)
        o_ref[...] = (out + bo_ref[...]).astype(o_ref.dtype)


# ---------------------------------------------------------------------------
# Parameter prep (one-time, at model load -- NOT on the per-call path)
# ---------------------------------------------------------------------------

def prepare_funcsgru_params(weights, biases, w_out, b_out,
                            weight_dtype=jnp.bfloat16):
    """weights:[L,H,H] (PyTorch [out,in] per layer), biases:[L,H], w_out:[O,H], b_out:[O]."""
    n_layer, H, _ = weights.shape
    O = w_out.shape[0]
    Hp = _round_up(H, _LANE)
    Op = _round_up(O, _LANE)

    w_t = jnp.transpose(weights, (0, 2, 1))                     # [L, in, out]
    w_t = jnp.pad(w_t, ((0, 0), (0, Hp - H), (0, Hp - H)))
    b_p = jnp.pad(biases, ((0, 0), (0, Hp - H)))
    wo_t = jnp.pad(jnp.transpose(w_out), ((0, Hp - H), (0, Op - O)))
    bo_p = jnp.pad(b_out, (0, Op - O))

    return {
        "w": w_t.astype(weight_dtype),                            # [L, Hp, Hp]
        "b": b_p.astype(jnp.float32).reshape(n_layer, 1, Hp),     # [L, 1, Hp]
        "wo": wo_t.astype(weight_dtype),                          # [Hp, Op]
        "bo": bo_p.astype(jnp.float32).reshape(1, Op),            # [1, Op]
        "hidden_dim": H,
        "output_dim": O,
    }


# ---------------------------------------------------------------------------
# Forward wrapper
# ---------------------------------------------------------------------------

def _vmem_budget_bytes():
    """Physical VMEM minus headroom for Mosaic internal scratch (generation-aware)."""
    cap = 64 << 20                          # conservative default (v7x per-TC)
    try:
        info = pltpu.get_tpu_info()
        cap = int(getattr(info, "vmem_capacity_bytes", cap) or cap)
    except Exception:
        pass
    headroom = max(8 << 20, cap // 8)       # ~8 MiB on v7x, ~16 MiB on v5e/v6e
    return cap - headroom


def funcsgru_forward(x, params, *, batch_tile=512):
    """x: [B, hidden_dim]  ->  [B, output_dim]."""
    w, b, wo, bo = params["w"], params["b"], params["wo"], params["bo"]
    H, O = params["hidden_dim"], params["output_dim"]
    n_layer, _, Hp = w.shape
    Op = wo.shape[1]
    assert n_layer >= 1, "need at least one hidden layer"
    B = x.shape[0]
    assert x.shape[1] == H

    out_dtype = x.dtype
    o_isz = jnp.dtype(out_dtype).itemsize
    w_isz = jnp.dtype(w.dtype).itemsize
    x_isz = 2                                # activations travel as bf16

    budget = _vmem_budget_bytes()

    # Resident-parameter footprint for the fused path.  Conservative: assume
    # the pipeline double-buffers every input block even with constant index
    # maps (we do not rely on pl.Buffered(1) support).
    fixed_fused = 2 * (n_layer * Hp * Hp * w_isz + n_layer * Hp * 4
                       + Hp * Op * w_isz + Op * 4)
    per_row_fused = (2 * Hp * x_isz        # x tile, double-buffered
                     + 2 * Op * o_isz      # out tile, double-buffered
                     + Hp * 4 + Hp * x_isz + Op * 4)   # f32 acc / bf16 h / f32 out temps
    use_fused = fixed_fused + _SUBLANE * per_row_fused <= budget

    # --- choose the batch tile --------------------------------------------
    Bp0 = _round_up(B, _SUBLANE)
    tb = min(_round_up(batch_tile, _SUBLANE), Bp0)
    if tb >= 256:
        tb = max(256, (tb // 256) * 256)          # 256-multiples feed the 256x256 MXU
    if Bp0 // tb < 2 and Bp0 >= 2 * _SUBLANE:
        tb = _round_up(_cdiv(Bp0, 2), _SUBLANE)   # >=2 parallel tiles for v7x's 2 TCs

    if use_fused:
        fixed, per_row = fixed_fused, per_row_fused
    else:
        # Streamed path: one layer weight in flight (double-buffered) + resident
        # output head + bf16 activation scratch.
        fixed = 2 * (Hp * Hp * w_isz + Hp * 4 + Hp * Op * w_isz + Op * 4)
        per_row = 2 * Hp * x_isz + 2 * Op * o_isz + Hp * x_isz + Hp * 4 + Op * 4

    while tb > _SUBLANE and fixed + tb * per_row > budget:
        tb = _round_up(tb // 2, _SUBLANE)

    TB = tb
    Bp = _round_up(Bp0, TB)
    grid_b = Bp // TB

    # Activation path is bf16: the MXU inputs are bf16 anyway, so numerics are
    # unchanged, while HBM<->VMEM traffic and the VMEM footprint halve.
    x_p = jnp.pad(x, ((0, Bp - B), (0, Hp - H))).astype(jnp.bfloat16)

    flops = 2 * Bp * Hp * (n_layer * Hp + Op)
    bytes_accessed = (Bp * Hp * x_isz + Bp * Op * o_isz
                      + n_layer * (Hp * Hp * w_isz + Hp * 4)
                      + Hp * Op * w_isz + Op * 4)
    cost = pl.CostEstimate(flops=flops, transcendentals=0,
                           bytes_accessed=bytes_accessed)

    vmem_limit = int(min(max(2 * (fixed + TB * per_row), 32 << 20), budget))

    if use_fused:
        out_p = pl.pallas_call(
            _fused_kernel,
            out_shape=jax.ShapeDtypeStruct((Bp, Op), out_dtype),
            grid_spec=pltpu.PrefetchScalarGridSpec(
                num_scalar_prefetch=0,
                grid=(grid_b,),
                in_specs=[
                    pl.BlockSpec((TB, Hp), lambda i: (i, 0)),            # x tile
                    pl.BlockSpec((n_layer, Hp, Hp), lambda i: (0, 0, 0)),  # W stack (resident)
                    pl.BlockSpec((n_layer, 1, Hp), lambda i: (0, 0, 0)),   # b stack (resident)
                    pl.BlockSpec((Hp, Op), lambda i: (0, 0)),            # W_out (resident)
                    pl.BlockSpec((1, Op), lambda i: (0, 0)),             # b_out (resident)
                ],
                out_specs=pl.BlockSpec((TB, Op), lambda i: (i, 0)),
            ),
            compiler_params=pltpu.CompilerParams(
                dimension_semantics=("parallel",),
                vmem_limit_bytes=vmem_limit,
            ),
            cost_estimate=cost,
        )(x_p, w, b, wo, bo)
    else:
        out_p = pl.pallas_call(
            _streamed_kernel,
            out_shape=jax.ShapeDtypeStruct((Bp, Op), out_dtype),
            grid_spec=pltpu.PrefetchScalarGridSpec(
                num_scalar_prefetch=0,
                grid=(grid_b, n_layer),
                in_specs=[
                    pl.BlockSpec((TB, Hp), lambda bt, l: (bt, 0)),        # x tile
                    pl.BlockSpec((None, Hp, Hp), lambda bt, l: (l, 0, 0)),  # W_l (streamed, squeezed)
                    pl.BlockSpec((None, 1, Hp), lambda bt, l: (l, 0, 0)),   # b_l (streamed, squeezed)
                    pl.BlockSpec((Hp, Op), lambda bt, l: (0, 0)),         # W_out (resident)
                    pl.BlockSpec((1, Op), lambda bt, l: (0, 0)),          # b_out (resident)
                ],
                out_specs=pl.BlockSpec((TB, Op), lambda bt, l: (bt, 0)),
                scratch_shapes=[pltpu.VMEM((TB, Hp), jnp.bfloat16)],
            ),
            compiler_params=pltpu.CompilerParams(
                dimension_semantics=("parallel", "arbitrary"),
                vmem_limit_bytes=vmem_limit,
            ),
            cost_estimate=cost,
        )(x_p, w, b, wo, bo)

    return out_p[:B, :O]


# ---------------------------------------------------------------------------
# References
# ---------------------------------------------------------------------------

def _reference_forward_f32(x, weights, biases, w_out, b_out):
    """Pure-f32 JAX reference mirroring the PyTorch module (eval mode)."""
    h = x
    for i in range(weights.shape[0]):
        h = jnp.maximum(h @ weights[i].T + biases[i], 0.0)
    return h @ w_out.T + b_out


def _reference_forward_bf16(x, weights, biases, w_out, b_out):
    """Reference matching the kernel numerics: bf16 matmul inputs, f32 accumulate."""
    h = x.astype(jnp.float32)
    for i in range(weights.shape[0]):
        hw = jnp.dot(h.astype(jnp.bfloat16), weights[i].T.astype(jnp.bfloat16),
                     preferred_element_type=jnp.float32)
        h = jnp.maximum(hw + biases[i], 0.0)
    out = jnp.dot(h.astype(jnp.bfloat16), w_out.T.astype(jnp.bfloat16),
                  preferred_element_type=jnp.float32)
    return (out + b_out).astype(x.dtype)


if __name__ == "__main__":
    # Small shapes implied by the module: x is [batch, hidden_dim].
    n_layer = 3
    batch = 24          # -> 2 parallel batch tiles (exercises padding + multi-tile)
    hidden_dim = 32
    output_dim = 16
    dpo = 0.1           # dropout prob (identity at inference)

    key = jax.random.PRNGKey(0)
    k_x, k_w, k_b, k_wo, k_bo = jax.random.split(key, 5)

    # Deterministic PyTorch-Linear-style init: U(-1/sqrt(in), 1/sqrt(in)).
    bound_h = 1.0 / (hidden_dim ** 0.5)
    x = jax.random.normal(k_x, (batch, hidden_dim), dtype=jnp.float32)
    weights = jax.random.uniform(
        k_w, (n_layer, hidden_dim, hidden_dim),
        minval=-bound_h, maxval=bound_h, dtype=jnp.float32)
    biases = jax.random.uniform(
        k_b, (n_layer, hidden_dim),
        minval=-bound_h, maxval=bound_h, dtype=jnp.float32)
    w_out = jax.random.uniform(
        k_wo, (output_dim, hidden_dim),
        minval=-bound_h, maxval=bound_h, dtype=jnp.float32)
    b_out = jax.random.uniform(
        k_bo, (output_dim,),
        minval=-bound_h, maxval=bound_h, dtype=jnp.float32)

    # One-time parameter prep (transpose + pad + bf16) -- outside the call path.
    params = prepare_funcsgru_params(weights, biases, w_out, b_out)

    out = funcsgru_forward(x, params)
    out = jax.block_until_ready(out)
    assert out.shape == (batch, output_dim)

    # Tight check vs a reference with the same bf16-weight numerics.
    ref_bf16 = _reference_forward_bf16(x, weights, biases, w_out, b_out)
    assert jnp.allclose(out, ref_bf16, atol=1e-3, rtol=1e-3), \
        "mismatch vs bf16-matched reference"

    # Loose check vs the pure-f32 PyTorch-semantics reference (bf16 rounding).
    ref_f32 = _reference_forward_f32(x, weights, biases, w_out, b_out)
    assert jnp.allclose(out, ref_f32, atol=5e-2, rtol=5e-2), \
        "mismatch vs f32 reference"

    print("KERNEL_OK")
</pallas_src>

<mosaic_0001>
module attributes {stable_mosaic.version = 11 : i64} {
  func.func @_fused_kernel(%arg0: i32, %arg1: memref<16x128xbf16, #tpu.memory_space<vmem>>, %arg2: memref<3x128x128xbf16, #tpu.memory_space<vmem>>, %arg3: memref<3x1x128xf32, #tpu.memory_space<vmem>>, %arg4: memref<128x128xbf16, #tpu.memory_space<vmem>>, %arg5: memref<1x128xf32, #tpu.memory_space<vmem>>, %arg6: memref<16x128xf32, #tpu.memory_space<vmem>>) attributes {dimension_semantics = [#tpu.dimension_semantics<parallel>], iteration_bounds = array<i64: 2>, scalar_prefetch = 0 : i64, scratch_operands = 0 : i64, tpu.core_type = #tpu.core_type<tc>, window_params = [{transform_indices = @transform_0, window_bounds = array<i64: 16, 128>}, {pipeline_mode = #tpu.pipeline_mode<synchronous>, transform_indices = @transform_1, window_bounds = array<i64: 3, 128, 128>}, {pipeline_mode = #tpu.pipeline_mode<synchronous>, transform_indices = @transform_2, window_bounds = array<i64: 3, 1, 128>}, {pipeline_mode = #tpu.pipeline_mode<synchronous>, transform_indices = @transform_3, window_bounds = array<i64: 128, 128>}, {pipeline_mode = #tpu.pipeline_mode<synchronous>, transform_indices = @transform_4, window_bounds = array<i64: 1, 128>}, {transform_indices = @transform_5, window_bounds = array<i64: 16, 128>}]} {
    %c0 = arith.constant 0 : index
    %c0_0 = arith.constant 0 : index
    %0 = vector.load %arg1[%c0, %c0_0] : memref<16x128xbf16, #tpu.memory_space<vmem>>, vector<16x128xbf16>
    %c0_1 = arith.constant 0 : index
    %c0_2 = arith.constant 0 : index
    %c0_3 = arith.constant 0 : index
    %1 = vector.load %arg2[%c0_1, %c0_2, %c0_3] : memref<3x128x128xbf16, #tpu.memory_space<vmem>>, vector<1x128x128xbf16>
    %2 = vector.shape_cast %1 : vector<1x128x128xbf16> to vector<128x128xbf16>
    %cst = arith.constant dense<0.000000e+00> : vector<16x128xf32>
    %3 = tpu.matmul %0, %2, %cst {dimension_numbers = #tpu.dot_dimension_numbers<[1], [0], [0], [1], [0, 0, 1, 1], [], []>} : vector<16x128xbf16>, vector<128x128xbf16>, vector<16x128xf32> -> vector<16x128xf32>
    %c0_4 = arith.constant 0 : index
    %c0_5 = arith.constant 0 : index
    %c0_6 = arith.constant 0 : index
    %4 = vector.load %arg3[%c0_4, %c0_5, %c0_6] : memref<3x1x128xf32, #tpu.memory_space<vmem>>, vector<1x1x128xf32>
    %5 = vector.shape_cast %4 : vector<1x1x128xf32> to vector<1x128xf32>
    %6 = vector.broadcast %5 : vector<1x128xf32> to vector<16x128xf32>
    %7 = arith.addf %3, %6 : vector<16x128xf32>
    %cst_7 = arith.constant 0.000000e+00 : f32
    %8 = vector.broadcast %cst_7 : f32 to vector<16x128xf32>
    %9 = arith.maximumf %7, %8 : vector<16x128xf32>
    %10 = arith.truncf %9 : vector<16x128xf32> to vector<16x128xbf16>
    %c1 = arith.constant 1 : index
    %c0_8 = arith.constant 0 : index
    %c0_9 = arith.constant 0 : index
    %11 = vector.load %arg2[%c1, %c0_8, %c0_9] : memref<3x128x128xbf16, #tpu.memory_space<vmem>>, vector<1x128x128xbf16>
    %12 = vector.shape_cast %11 : vector<1x128x128xbf16> to vector<128x128xbf16>
    %cst_10 = arith.constant dense<0.000000e+00> : vector<16x128xf32>
    %13 = tpu.matmul %10, %12, %cst_10 {dimension_numbers = #tpu.dot_dimension_numbers<[1], [0], [0], [1], [0, 0, 1, 1], [], []>} : vector<16x128xbf16>, vector<128x128xbf16>, vector<16x128xf32> -> vector<16x128xf32>
    %c1_11 = arith.constant 1 : index
    %c0_12 = arith.constant 0 : index
    %c0_13 = arith.constant 0 : index
    %14 = vector.load %arg3[%c1_11, %c0_12, %c0_13] : memref<3x1x128xf32, #tpu.memory_space<vmem>>, vector<1x1x128xf32>
    %15 = vector.shape_cast %14 : vector<1x1x128xf32> to vector<1x128xf32>
    %16 = vector.broadcast %15 : vector<1x128xf32> to vector<16x128xf32>
    %17 = arith.addf %13, %16 : vector<16x128xf32>
    %cst_14 = arith.constant 0.000000e+00 : f32
    %18 = vector.broadcast %cst_14 : f32 to vector<16x128xf32>
    %19 = arith.maximumf %17, %18 : vector<16x128xf32>
    %20 = arith.truncf %19 : vector<16x128xf32> to vector<16x128xbf16>
    %c2 = arith.constant 2 : index
    %c0_15 = arith.constant 0 : index
    %c0_16 = arith.constant 0 : index
    %21 = vector.load %arg2[%c2, %c0_15, %c0_16] : memref<3x128x128xbf16, #tpu.memory_space<vmem>>, vector<1x128x128xbf16>
    %22 = vector.shape_cast %21 : vector<1x128x128xbf16> to vector<128x128xbf16>
    %cst_17 = arith.constant dense<0.000000e+00> : vector<16x128xf32>
    %23 = tpu.matmul %20, %22, %cst_17 {dimension_numbers = #tpu.dot_dimension_numbers<[1], [0], [0], [1], [0, 0, 1, 1], [], []>} : vector<16x128xbf16>, vector<128x128xbf16>, vector<16x128xf32> -> vector<16x128xf32>
    %c2_18 = arith.constant 2 : index
    %c0_19 = arith.constant 0 : index
    %c0_20 = arith.constant 0 : index
    %24 = vector.load %arg3[%c2_18, %c0_19, %c0_20] : memref<3x1x128xf32, #tpu.memory_space<vmem>>, vector<1x1x128xf32>
    %25 = vector.shape_cast %24 : vector<1x1x128xf32> to vector<1x128xf32>
    %26 = vector.broadcast %25 : vector<1x128xf32> to vector<16x128xf32>
    %27 = arith.addf %23, %26 : vector<16x128xf32>
    %cst_21 = arith.constant 0.000000e+00 : f32
    %28 = vector.broadcast %cst_21 : f32 to vector<16x128xf32>
    %29 = arith.maximumf %27, %28 : vector<16x128xf32>
    %30 = arith.truncf %29 : vector<16x128xf32> to vector<16x128xbf16>
    %c0_22 = arith.constant 0 : index
    %c0_23 = arith.constant 0 : index
    %31 = vector.load %arg4[%c0_22, %c0_23] : memref<128x128xbf16, #tpu.memory_space<vmem>>, vector<128x128xbf16>
    %cst_24 = arith.constant dense<0.000000e+00> : vector<16x128xf32>
    %32 = tpu.matmul %30, %31, %cst_24 {dimension_numbers = #tpu.dot_dimension_numbers<[1], [0], [0], [1], [0, 0, 1, 1], [], []>} : vector<16x128xbf16>, vector<128x128xbf16>, vector<16x128xf32> -> vector<16x128xf32>
    %c0_25 = arith.constant 0 : index
    %c0_26 = arith.constant 0 : index
    %33 = vector.load %arg5[%c0_25, %c0_26] : memref<1x128xf32, #tpu.memory_space<vmem>>, vector<1x128xf32>
    %34 = vector.broadcast %33 : vector<1x128xf32> to vector<16x128xf32>
    %35 = arith.addf %32, %34 : vector<16x128xf32>
    %c0_27 = arith.constant 0 : index
    %c0_28 = arith.constant 0 : index
    %36 = vector.load %arg6[%c0_27, %c0_28] : memref<16x128xf32, #tpu.memory_space<vmem>>, vector<16x128xf32>
    tpu.vector_store %arg6[%c0_27, %c0_28], %35 {strides = array<i32>} : memref<16x128xf32, #tpu.memory_space<vmem>>, vector<16x128xf32>,
    return
  }
  func.func @transform_0(%arg0: i32) -> (i32, i32) {
    %c0_i32 = arith.constant 0 : i32
    %c0_i32_0 = arith.constant 0 : i32
    return %arg0, %c0_i32 : i32, i32
  }
  func.func @transform_1(%arg0: i32) -> (i32, i32, i32) {
    %c0_i32 = arith.constant 0 : i32
    %c0_i32_0 = arith.constant 0 : i32
    %c0_i32_1 = arith.constant 0 : i32
    %c0_i32_2 = arith.constant 0 : i32
    return %c0_i32, %c0_i32_0, %c0_i32_1 : i32, i32, i32
  }
  func.func @transform_2(%arg0: i32) -> (i32, i32, i32) {
    %c0_i32 = arith.constant 0 : i32
    %c0_i32_0 = arith.constant 0 : i32
    %c0_i32_1 = arith.constant 0 : i32
    %c0_i32_2 = arith.constant 0 : i32
    return %c0_i32, %c0_i32_0, %c0_i32_1 : i32, i32, i32
  }
  func.func @transform_3(%arg0: i32) -> (i32, i32) {
    %c0_i32 = arith.constant 0 : i32
    %c0_i32_0 = arith.constant 0 : i32
    %c0_i32_1 = arith.constant 0 : i32
    return %c0_i32, %c0_i32_0 : i32, i32
  }
  func.func @transform_4(%arg0: i32) -> (i32, i32) {
    %c0_i32 = arith.constant 0 : i32
    %c0_i32_0 = arith.constant 0 : i32
    %c0_i32_1 = arith.constant 0 : i32
    return %c0_i32, %c0_i32_0 : i32, i32
  }
  func.func @transform_5(%arg0: i32) -> (i32, i32) {
    %c0_i32 = arith.constant 0 : i32
    %c0_i32_0 = arith.constant 0 : i32
    return %arg0, %c0_i32 : i32, i32
  }
}

</mosaic_0001>

<bundles_post_ra>
// kernel: tpu_custom_call.1
= control target key start
LH: loop header
LB: loop body
LE: loop exit
PB: predicated region body
PF: predicated region fallthrough
CT: control target
= control target key end

     0   :  { %10 = vsyncpa [#allocation3], 0  ;;  %s1630_s0 = inlined_call_operand.hbm [shape: bf16[32,128], index: 0, kind: input, shape index: {}]   ;;  %s1631_s1 = inlined_call_operand.hbm [shape: bf16[3,128,128], index: 1, kind: input, shape index: {}]   ;;  %s1632_s2 = inlined_call_operand.vmem [shape: f32[3,1,128], index: 2, kind: input, shape index: {}]   ;;  %s1633_s3 = inlined_call_operand.hbm [shape: bf16[128,128], index: 3, kind: input, shape index: {}]   ;;  %s1634_s4 = inlined_call_operand.vmem [shape: f32[1,128], index: 4, kind: input, shape index: {}]   ;;  %s1635_s5 = inlined_call_operand.hbm [shape: f32[32,128], index: 5, kind: output, shape index: {}]  }
   0x1   :  { %12 = vsyncpa [#allocation3 + $0x1], 0 }
   0x2   :  { %13 = vsyncpa [#allocation6], 0 }
   0x3   :  { %14 = vsyncpa [#allocation4], 0 }
   0x4   :  { %16 = vsyncpa [#allocation4 + $0x1], 0  ;;  %s1331_s18 = smov 0   ;;  %s1333_s19 = smov 0  }
   0x5   :  { %s1335_s20 = smov 0   ;;  %s1337_s21 = smov 0  }
   0x6 LB: > { %s1352_s22 = sadd.s32 4294967295, %s1289_s21   ;;  %s852_s23 = sadd.s32 4294967294, %s1289_s21   ;;  %s1289_s21 = sphi %s1337_s21, %s1655_s21   ;;  %s1285_s20 = sphi %s1335_s20, %s1654_s20   ;;  %s1281_s19 = sphi %s1333_s19, %s1653_s19   ;;  %s1277_s18 = sphi %s1331_s18, %s1652_s18  }
   0x7   : > { %p42_p0 = scmp.ne.s32.totalorder %s1281_s19, %s1277_s18  ;;  %p1636_p1 = scmp.eq.s32.totalorder %s1352_s22, 0 }
   0x8   : > { %p156_p3 = scmp.eq.s32.totalorder %s852_s23, 1  ;;  %p853_p5 = scmp.ge.s32.totalorder %s1289_s21, 1 }
   0x9   : > { %p1361_p4 = por %p1636_p1, %p42_p0  ;;  %p163_p7 = scmp.lt.s32.totalorder %s1289_s21, 3 }
   0xa   : > { %p1366_p6 = por %p156_p3, %p42_p0  ;;  %s1291_s27 = smov [#allocation5]  }
   0xb   : > { %s1639_s24 = scalar_select %p1361_p4, 1, 0 }
   0xc   : > { %s1640_s25 = scalar_select %p1366_p6, 1, 0 }
   0xd   : > { %p1371_p8 = pnand %p853_p5, %p163_p7  ;;  %s175_s28 = sshll.u32 %s1291_s27, 4  ;;  %s1375_s28 = int_to_ptr.vmem [resolvable:$true] %s175_s28 }
   0xe   : > { %s1292_s30 = smov [#allocation7]   ;;  %s1133_s9 = scalar_lea.hbm %s1631_s1, 3072 }
   0xf   : > { %p1039_p9 = pneg %p1371_p8  ;;  %s191_s6 = sshll.u32 %s1292_s30, 4  ;;  %s1386_s6 = int_to_ptr.vmem [resolvable:$true] %s191_s6 }
  0x10   : > { %p1134_p12 = scmp.ne.s32.totalorder %s1631_s1, %s1133_s9  ;;  %p1140_p5 = scmp.lt.u32.totalorder %s1133_s9, %s1631_s1 }
  0x11   : > { %p1382_p11 = pnand %p1039_p9, %p1636_p1 }
  0x13   : > { %p1135_p13 = pneg %p1382_p11 }
  0x15   : > { %p1136_p0 = pnand %p1135_p13, %p1134_p12 }
  0x17   : > { %p1137_p3 = pneg %p1136_p0 }
  0x19   : > { %p1142_p7 = pnand %p1140_p5, %p1137_p3 }
  0x1b   : > { %1145 = shalt.err (!%p1142_p7)
}
  0x1c   : > { %s1146_s14 = scalar_lea.vmem %s1375_s28, 3072  ;;  %p1154_p2 = scmp.lt.s32.totalorder %s1375_s28, %s1375_s28 }
  0x1d   : > { %p1147_p9 = scmp.ne.s32.totalorder %s1375_s28, %s1146_s14  ;;  %p1155_p12 = scmp.lt.s32.totalorder %s1146_s14, %s1146_s14 }
  0x1f   : > { %p1149_p10 = pnand %p1147_p9, %p1135_p13  ;;  %p1156_p0 = por %p1155_p12, %p1154_p2 }
  0x21   : > { %p1150_p1 = pneg %p1149_p10 }
  0x23   : > { %p1157_p6 = pnand %p1156_p0, %p1150_p1 }
  0x25   : > { %1160 = shalt.err (!%p1157_p6)
}
  0x26   : > { %s1293_s15 = smov 64   ;;  %s1294_s16 = smov 4  }
  0x27   : > { %1042 = dma.hbm_to_vmem [thread:$0]  (!%p1382_p11), %s1631_s1, 3072, %s1375_s28, [#allocation6], %s1293_s15, %s1293_s15, %s1294_s16  }
  0x28   : > { %s1161_s7 = scalar_lea.hbm %s1633_s3, 1024 }
  0x29   : > { %p1162_p1 = scmp.ne.s32.totalorder %s1633_s3, %s1161_s7  ;;  %p1168_p10 = scmp.lt.u32.totalorder %s1161_s7, %s1633_s3 }
  0x2b   : > { %p1164_p2 = pnand %p1162_p1, %p1135_p13 }
  0x2d   : > { %p1165_p6 = pneg %p1164_p2 }
  0x2f   : > { %p1170_p3 = pnand %p1168_p10, %p1165_p6 }
  0x31   : > { %1173 = shalt.err (!%p1170_p3)
}
  0x32   : > { %s1174_s28 = scalar_lea.vmem %s1386_s6, 1024  ;;  %p1182_p12 = scmp.lt.s32.totalorder %s1386_s6, %s1386_s6 }
  0x33   : > { %p1175_p5 = scmp.ne.s32.totalorder %s1386_s6, %s1174_s28  ;;  %p1183_p0 = scmp.lt.s32.totalorder %s1174_s28, %s1174_s28 }
  0x35   : > { %p1177_p7 = pnand %p1175_p5, %p1135_p13  ;;  %p1184_p1 = por %p1183_p0, %p1182_p12 }
  0x37   : > { %p1178_p9 = pneg %p1177_p7 }
  0x39   : > { %p1185_p2 = pnand %p1184_p1, %p1178_p9 }
  0x3b   : > { %1188 = shalt.err (!%p1185_p2)
}
  0x3c   : > { %1045 = dma.hbm_to_vmem [thread:$0]  (!%p1382_p11), %s1633_s3, 1024, %s1386_s6, [#allocation6], %s1293_s15, %s1293_s15, %s1294_s16  }
  0x3d   : > { %s1447_s29 = sadd.s32 1, %s1289_s21   ;;  %s29_s14 = sadd.s32 1, %s1285_s20 }
  0x3e   : > { %s26_s17 = ssub.s32 %s1289_s21, %s1447_s29  ;;  %p36_p13 = scmp.ne.s32.totalorder %s1285_s20, %s1281_s19 }
  0x3f   : > { %p27_p6 = scmp.eq.s32.totalorder %s26_s17, 0  ;;  %p37_p10 = scmp.eq.s32.totalorder %s1289_s21, 0 }
  0x40   : > { %p1643_p3 = scmp.eq.s32.totalorder %s1352_s22, 1  ;;  %p1056_p7 = scmp.lt.s32.totalorder %s1289_s21, 2 }
  0x41   : > { %s1463_s27 = scalar_select %p27_p6, %s1285_s20, %s29_s14  }
  0x42   : > { %p1457_p5 = por %p1643_p3, %p36_p13  ;;  %p38_p9 = por %p37_p10, %p36_p13 }
  0x43   : > { %s208_s30 = sand.u32 1, %s1285_s20   ;;  %s909_s6 = sshll.u32 %s1289_s21, 7 }
  0x44   : > { %s1644_s23 = scalar_select %p1457_p5, 1, 0 }
  0x45   : > { %s857_s7 = sshll.u32 %s208_s30, 3  ;;  %s1470_s10 = scalar_lea.hbm %s1630_s0, %s909_s6 }
  0x46   : > { %s212_s11 = scalar_lea.vmem [#allocation2], %s857_s7  ;;  %p1474_p11 = pnand %p1056_p7, %p38_p9 }
  0x47   : > { %s219_s28 = sshll.u32 %s212_s11, 4  ;;  %s1478_s13 = scalar_lea.sflag [#allocation3], %s208_s30  ;;  %s1472_s28 = int_to_ptr.vmem [resolvable:$true] %s219_s28 }
  0x48   : > { %s1189_s14 = scalar_lea.hbm %s1470_s10, 128  ;;  %p1191_p0 = pneg %p1474_p11 }
  0x49   : > { %p1190_p12 = scmp.ne.s32.totalorder %s1470_s10, %s1189_s14  ;;  %s1194_s6 = scalar_lea.hbm %s1630_s0, 256 }
  0x4a   : > { %p1195_p13 = scmp.lt.u32.totalorder %s1470_s10, %s1630_s0  ;;  %p1196_p6 = scmp.lt.u32.totalorder %s1194_s6, %s1189_s14 }
  0x4b   : > { %p1192_p1 = pnand %p1191_p0, %p1190_p12  ;;  %p1198_p3 = scmp.lt.u32.totalorder %s1189_s14, %s1470_s10 }
  0x4c   : > { %p1197_p10 = por %p1196_p6, %p1195_p13 }
  0x4d   : > { %p1193_p2 = pneg %p1192_p1 }
  0x4e   : > { %p1199_p7 = por %p1198_p3, %p1197_p10 }
  0x50   : > { %p1200_p9 = pnand %p1199_p7, %p1193_p2 }
  0x52   : > { %1203 = shalt.err (!%p1200_p9)
}
  0x53   : > { %s1204_s30 = scalar_lea.vmem %s1472_s28, 128  ;;  %s1295_s11 = smov [#allocation2]  }
  0x54   : > { %p1205_p12 = scmp.ne.s32.totalorder %s1472_s28, %s1204_s30  ;;  %s1209_s17 = sshll.u32 %s1295_s11, 4  ;;  %s1210_s17 = int_to_ptr.vmem [resolvable:$false] %s1209_s17 }
  0x55   : > { %s1211_s7 = scalar_lea.vmem %s1210_s17, 256  ;;  %p1212_p4 = scmp.lt.s32.totalorder %s1472_s28, %s1210_s17 }
  0x56   : > { %p1207_p1 = pnand %p1205_p12, %p1191_p0  ;;  %p1213_p13 = scmp.lt.s32.totalorder %s1211_s7, %s1204_s30 }
  0x58   : > { %p1208_p5 = pneg %p1207_p1  ;;  %p1214_p6 = por %p1213_p13, %p1212_p4 }
  0x5a   : > { %p1215_p10 = pnand %p1214_p6, %p1208_p5 }
  0x5c   : > { %1218 = shalt.err (!%p1215_p10)
}
  0x5d   : > { %1049 = dma.hbm_to_vmem [thread:$0]  (!%p1474_p11), %s1470_s10, 128, %s1472_s28, %s1478_s13, %s1293_s15, %s1293_s15, %s1294_s16  }
  0x5e   : > { %231 = sbr.rel (%p1371_p8) target bundleno = 1030 (0x406), region = 40  ;;  %s1512_s14 = sand.u32 (!%p1371_p8), 1, %s1281_s19  }
  0x5f   : > { %s861_s6 = sshll.u32 (!%p1371_p8), %s1512_s14, 3  ;;  %s234_s8 = scalar_lea.sflag (!%p1371_p8), [#allocation3], %s1512_s14 }
  0x60   : > { %s1516_s9 = scalar_lea.vmem (!%p1371_p8), [#allocation2], %s861_s6  ;;  %p1646_p4 = scmp.ne.s32.totalorder (!%p1371_p8), %s1639_s24, 0 }
  0x65   : > { %1264 = dma.done.wait (%p1646_p4), %s234_s8, 128  }
  0x66   : > { %1266 = vsyncadd (%p1646_p4), %s234_s8, 4294967168  ;;  %p1647_p5 = scmp.eq.s32.totalorder %s1352_s22, 0 }
  0x68   : > { %1268 = dma.done.wait (%p1647_p5), [#allocation6], 4096   ;;  %p1648_p8 = pmov %p1647_p5 }
  0x69   : > { %v1296_v0 = vmov 0.0   ;;  %vm1297_vm0 = vmmov 0   ;;  %v1100_v1 = vld [vmem:[#allocation5] sm:$0xff]   ;;  %v1101_v2 = vld [vmem:[#allocation5 + $0x8] sm:$0xff]   ;;  %v1102_v3 = vld [vmem:[#allocation5 + $0x10] sm:$0xff]   ;;  %s864_s12 = sshll.u32 %s1512_s14, 4 }
  0x6a   : > { %1270 = vsyncadd (%p1648_p8), [#allocation6], 4294963200  ;;  %947 = vmatprep.subr.bf16.mxu0 %v1296_v0  ;;  %963 = vmatprep.mubr.msk.bf16.mxu0 %vm1297_vm0, %v1296_v0  ;;  %v1109_v4 = vld [vmem:[#allocation5 + $0x40] sm:$0xff]   ;;  %v1103_v5 = vld [vmem:[#allocation5 + $0x18] sm:$0xff]   ;;  %s271_s11 = scalar_lea.vmem [#allocation8], %s864_s12  ;;  %s910_s7 = sshll.u32 %s1352_s22, 8 }
  0x6b   : > { %967 = vmatprep.subr.bf16.mxu1 %v1296_v0  ;;  %983 = vmatprep.mubr.msk.bf16.mxu1 %vm1297_vm0, %v1296_v0  ;;  %v1110_v6 = vld [vmem:[#allocation5 + $0x48] sm:$0xff]   ;;  %v1104_v7 = vld [vmem:[#allocation5 + $0x20] sm:$0xff]   ;;  %v1111_v8 = vld [vmem:[#allocation5 + $0x50] sm:$0xff]   ;;  %s760_s17 = sshll.u32 %s271_s11, 4  ;;  %s747_s24 = scalar_lea.sflag [#allocation4], %s1512_s14  ;;  %s1581_s17 = int_to_ptr.vmem [resolvable:$true] %s760_s17 }
  0x6c   : > { %948 = vmatpush3.bf16.msra.mxu0 %v1100_v1  ;;  %968 = vmatpush3.bf16.msra.mxu1 %v1109_v4  ;;  %v1105_v9 = vld [vmem:[#allocation5 + $0x28] sm:$0xff]   ;;  %v1112_v10 = vld [vmem:[#allocation5 + $0x58] sm:$0xff]   ;;  %v1106_v11 = vld [vmem:[#allocation5 + $0x30] sm:$0xff]   ;;  %s1219_s22 = scalar_lea.vmem %s1581_s17, 256  ;;  %p1649_p0 = scmp.ne.s32.totalorder %s1644_s23, 0 }
  0x6d   : > { %949 = vmatprep.subr.bf16.mxu0 %v1296_v0  ;;  %969 = vmatprep.subr.bf16.mxu1 %v1296_v0  ;;  %v1113_v12 = vld [vmem:[#allocation5 + $0x60] sm:$0xff]   ;;  %v1107_v13 = vld [vmem:[#allocation5 + $0x38] sm:$0xff]   ;;  %v1114_v14 = vld [vmem:[#allocation5 + $0x68] sm:$0xff]   ;;  %p1220_p11 = scmp.ne.s32.totalorder %s1581_s17, %s1219_s22  ;;  %s1298_s26 = smov [#allocation8]  }
  0x6e   : > { %v1108_v15 = vld [vmem:[%s1516_s9] sm:$0xff]   ;;  %v1117_v18 = vld [vmem:[#allocation5 + $0x80] sm:$0xff]   ;;  %v1118_v19 = vld [vmem:[#allocation5 + $0x88] sm:$0xff]   ;;  %s1586_s9 = scalar_lea.hbm %s1635_s5, %s910_s7  ;;  %s1223_s15 = sshll.u32 %s1298_s26, 4  ;;  %s1224_s15 = int_to_ptr.vmem [resolvable:$false] %s1223_s15 }
  0x6f   : > { %v1115_v16 = vld [vmem:[#allocation5 + $0x70] sm:$0xff]   ;;  %v1116_v17 = vld [vmem:[#allocation5 + $0x78] sm:$0xff]   ;;  %v1121_v22 = vld [vmem:[#allocation5 + $0xa0] sm:$0xff]   ;;  %p1221_p2 = pnand %p1220_p11, %p1649_p0  ;;  %s1225_s16 = scalar_lea.vmem %s1224_s15, 512 }
  0x70   : > { %950 = vmatpush3.bf16.msra.mxu0 %v1101_v2  ;;  %970 = vmatpush3.bf16.msra.mxu1 %v1110_v6  ;;  %v1119_v20 = vld [vmem:[#allocation5 + $0x90] sm:$0xff]   ;;  %v1120_v21 = vld [vmem:[#allocation5 + $0x98] sm:$0xff]   ;;  %v1122_v23 = vld [vmem:[#allocation5 + $0xa8] sm:$0xff]   ;;  %p1226_p7 = scmp.lt.s32.totalorder %s1581_s17, %s1224_s15  ;;  %p1227_p9 = scmp.lt.s32.totalorder %s1225_s16, %s1219_s22 }
  0x71   : > { %951 = vmatprep.subr.bf16.mxu0 %v1296_v0  ;;  %971 = vmatprep.subr.bf16.mxu1 %v1296_v0  ;;  %v865_v24 = vld [vmem:[%s1632_s2] ss:$0 sm:$0xff]  ;;  %v1124_v35 = vld [vmem:[#allocation5 + $0xb8] sm:$0xff]   ;;  %v1125_v36 = vld [vmem:[#allocation7] sm:$0xff]   ;;  %p1222_p3 = pneg %p1221_p2 }
  0x72   : > { %v1123_v34 = vld [vmem:[#allocation5 + $0xb0] sm:$0xff]   ;;  %v1126_v37 = vld [vmem:[#allocation7 + $0x8] sm:$0xff]   ;;  %v1128_v39 = vld [vmem:[#allocation7 + $0x18] sm:$0xff]   ;;  %p1228_p12 = por %p1227_p9, %p1226_p7 }
  0x73   : > { %v1127_v38 = vld [vmem:[#allocation7 + $0x10] sm:$0xff]   ;;  %v1129_v40 = vld [vmem:[#allocation7 + $0x20] sm:$0xff]   ;;  %v1130_v41 = vld [vmem:[#allocation7 + $0x28] sm:$0xff]  }
  0x74   : > { %952 = vmatpush3.bf16.msra.mxu0 %v1102_v3  ;;  %972 = vmatpush3.bf16.msra.mxu1 %v1111_v8  ;;  %v876_v42 = vld [vmem:[%s1632_s2 + $0x1] ss:$0 sm:$0xff]  ;;  %v1132_v53 = vld [vmem:[#allocation7 + $0x38] sm:$0xff]   ;;  %v886_v54 = vld [vmem:[%s1632_s2 + $0x2] ss:$0 sm:$0xff]  ;;  %p1229_p1 = pnand %p1228_p12, %p1222_p3 }
  0x75   : > { %953 = vmatprep.subr.bf16.mxu0 %v1296_v0  ;;  %973 = vmatprep.subr.bf16.mxu1 %v1296_v0  ;;  %v1131_v52 = vld [vmem:[#allocation7 + $0x30] sm:$0xff]  }
  0x78   : > { %954 = vmatpush3.bf16.msra.mxu0 %v1103_v5  ;;  %974 = vmatpush3.bf16.msra.mxu1 %v1112_v10 }
  0x79   : > { %955 = vmatprep.subr.bf16.mxu0 %v1296_v0  ;;  %975 = vmatprep.subr.bf16.mxu1 %v1296_v0 }
  0x7c   : > { %956 = vmatpush3.bf16.msra.mxu0 %v1104_v7  ;;  %976 = vmatpush3.bf16.msra.mxu1 %v1113_v12 }
  0x7d   : > { %957 = vmatprep.subr.bf16.mxu0 %v1296_v0  ;;  %977 = vmatprep.subr.bf16.mxu1 %v1296_v0 }
  0x80   : > { %958 = vmatpush3.bf16.msra.mxu0 %v1105_v9  ;;  %978 = vmatpush3.bf16.msra.mxu1 %v1114_v14 }
  0x81   : > { %959 = vmatprep.subr.bf16.mxu0 %v1296_v0  ;;  %979 = vmatprep.subr.bf16.mxu1 %v1296_v0 }
  0x84   : > { %960 = vmatpush3.bf16.msra.mxu0 %v1106_v11  ;;  %980 = vmatpush3.bf16.msra.mxu1 %v1115_v16 }
  0x85   : > { %961 = vmatprep.subr.bf16.mxu0 %v1296_v0  ;;  %981 = vmatprep.subr.bf16.mxu1 %v1296_v0 }
  0x88   : > { %962 = vmatpush3.bf16.msra.mxu0 %v1107_v13  ;;  %982 = vmatpush3.bf16.msra.mxu1 %v1116_v17 }
  0x89   : > { %987 = vmatprep.subr.bf16.mxu0 %v1296_v0  ;;  %1007 = vmatprep.subr.bf16.mxu1 %v1296_v0 }
  0x8b   : > { %964 = vmatmul.mubr.bf16.vlgmr.msra.gmra.mrb[0].mxu0 %v1108_v15 }
  0x8c   : > { %1003 = vmatprep.mubr.msk.bf16.mxu0 %vm1297_vm0, %v1296_v0  ;;  %988 = vmatpush3.bf16.msra.mxu0 %v1117_v18 }
  0x8d   : > { %989 = vmatprep.subr.bf16.mxu0 %v1296_v0 }
  0x90   : > { %990 = vmatpush3.bf16.msra.mxu0 %v1118_v19 }
  0x91   : > { %991 = vmatprep.subr.bf16.mxu0 %v1296_v0 }
  0x94   : > { %992 = vmatpush3.bf16.msra.mxu0 %v1119_v20 }
  0x95   : > { %993 = vmatprep.subr.bf16.mxu0 %v1296_v0 }
  0x98   : > { %994 = vmatpush3.bf16.msra.mxu0 %v1120_v21 }
  0x99   : > { %995 = vmatprep.subr.bf16.mxu0 %v1296_v0 }
  0x9c   : > { %996 = vmatpush3.bf16.msra.mxu0 %v1121_v22 }
  0x9d   : > { %997 = vmatprep.subr.bf16.mxu0 %v1296_v0 }
  0xa0   : > { %998 = vmatpush3.bf16.msra.mxu0 %v1122_v23 }
  0xa1   : > { %999 = vmatprep.subr.bf16.mxu0 %v1296_v0 }
  0xa4   : > { %1000 = vmatpush3.bf16.msra.mxu0 %v1123_v34 }
  0xa5   : > { %1001 = vmatprep.subr.bf16.mxu0 %v1296_v0 }
  0xa8   : > { %1002 = vmatpush3.bf16.msra.mxu0 %v1124_v35 }
 0x15e   : > { %v388_v25 = vpop.f32.mrb[0].mxu0 }
 0x15f   : > { %v389_v26 = vadd.f32 %v865_v24, %v388_v25  ;;  %v965_v27 = vpop.f32.mrb[1].mxu0 }
 0x160   : > { %v391_v28 = vpop.f32.mrb[2].mxu0 }
 0x161   : > { %v392_v29 = vadd.f32 %v865_v24, %v391_v28  ;;  %v966_v30 = vpop.f32.mrb[3].mxu0  ;;  %v395_v31 = vmax.f32 %v389_v26, 0.0 }
 0x163   : > { %v396_v32 = vmax.f32 %v392_v29, 0.0 }
 0x165   : > { %v397_v33 = vpack.c.bf16 %v396_v32, %v395_v31 }
 0x167   : > { %984 = vmatmul.mubr.bf16.vlgmr.msra.gmra.mrb[0].mxu1 %v397_v33 }
 0x168   : > { %1023 = vmatprep.mubr.msk.bf16.mxu1 %vm1297_vm0, %v1296_v0  ;;  %1008 = vmatpush3.bf16.msra.mxu1 %v1125_v36 }
 0x169   : > { %1009 = vmatprep.subr.bf16.mxu1 %v1296_v0 }
 0x16c   : > { %1010 = vmatpush3.bf16.msra.mxu1 %v1126_v37 }
 0x16d   : > { %1011 = vmatprep.subr.bf16.mxu1 %v1296_v0 }
 0x170   : > { %1012 = vmatpush3.bf16.msra.mxu1 %v1127_v38 }
 0x171   : > { %1013 = vmatprep.subr.bf16.mxu1 %v1296_v0 }
 0x174   : > { %1014 = vmatpush3.bf16.msra.mxu1 %v1128_v39 }
 0x175   : > { %1015 = vmatprep.subr.bf16.mxu1 %v1296_v0 }
 0x178   : > { %1016 = vmatpush3.bf16.msra.mxu1 %v1129_v40 }
 0x179   : > { %1017 = vmatprep.subr.bf16.mxu1 %v1296_v0 }
 0x17c   : > { %1018 = vmatpush3.bf16.msra.mxu1 %v1130_v41 }
 0x17d   : > { %1019 = vmatprep.subr.bf16.mxu1 %v1296_v0 }
 0x180   : > { %1020 = vmatpush3.bf16.msra.mxu1 %v1131_v52 }
 0x181   : > { %1021 = vmatprep.subr.bf16.mxu1 %v1296_v0  ;;  %v895_v0 = vld [vmem:[%s1634_s4] ss:$0 sm:$0xff] }
 0x184   : > { %1022 = vmatpush3.bf16.msra.mxu1 %v1132_v53 }
 0x23a   : > { %v505_v43 = vpop.f32.mrb[0].mxu1 }
 0x23b   : > { %v506_v44 = vadd.f32 %v876_v42, %v505_v43  ;;  %v985_v45 = vpop.f32.mrb[1].mxu1 }
 0x23c   : > { %v508_v46 = vpop.f32.mrb[2].mxu1 }
 0x23d   : > { %v509_v47 = vadd.f32 %v876_v42, %v508_v46  ;;  %v986_v48 = vpop.f32.mrb[3].mxu1  ;;  %v512_v49 = vmax.f32 %v506_v44, 0.0 }
 0x23f   : > { %v513_v50 = vmax.f32 %v509_v47, 0.0 }
 0x241   : > { %v514_v51 = vpack.c.bf16 %v513_v50, %v512_v49 }
 0x243   : > { %1004 = vmatmul.mubr.bf16.vlgmr.msra.gmra.mrb[4].mxu0 %v514_v51 }
 0x316   : > { %v622_v55 = vpop.f32.mrb[4].mxu0 }
 0x317   : > { %v623_v56 = vadd.f32 %v886_v54, %v622_v55  ;;  %v1005_v57 = vpop.f32.mrb[5].mxu0 }
 0x318   : > { %v625_v58 = vpop.f32.mrb[6].mxu0 }
 0x319   : > { %v626_v59 = vadd.f32 %v886_v54, %v625_v58  ;;  %v1006_v60 = vpop.f32.mrb[7].mxu0  ;;  %v629_v61 = vmax.f32 %v623_v56, 0.0 }
 0x31b   : > { %v630_v62 = vmax.f32 %v626_v59, 0.0 }
 0x31d   : > { %v631_v63 = vpack.c.bf16 %v630_v62, %v629_v61 }
 0x31f   : > { %1024 = vmatmul.mubr.bf16.vlgmr.msra.gmra.mrb[4].mxu1 %v631_v63 }
 0x3f2   : > { %v737_v1 = vpop.f32.mrb[4].mxu1 }
 0x3f3   : > { %v738_v2 = vadd.f32 %v895_v0, %v737_v1  ;;  %v1025_v3 = vpop.f32.mrb[5].mxu1 }
 0x3f4   : > { %v740_v4 = vpop.f32.mrb[6].mxu1 }
 0x3f5   : > { %744 = vst [vmem:[%s271_s11] sm:$0xff] %v738_v2  ;;  %v741_v5 = vadd.f32 %v895_v0, %v740_v4  ;;  %v1026_v6 = vpop.f32.mrb[7].mxu1 }
 0x3f7   : > { %745 = vst [vmem:[%s271_s11 + $0x8] sm:$0xff] %v741_v5 }
 0x3f8   : > { %1232 = shalt.err (!%p1229_p1)
}
 0x3f9   : > { %s1233_s10 = scalar_lea.hbm %s1586_s9, 256  ;;  %s1237_s13 = scalar_lea.hbm %s1635_s5, 512 }
 0x3fa   : > { %p1234_p13 = scmp.ne.s32.totalorder %s1586_s9, %s1233_s10  ;;  %p1238_p4 = scmp.lt.u32.totalorder %s1586_s9, %s1635_s5 }
 0x3fb   : > { %p1239_p5 = scmp.lt.u32.totalorder %s1237_s13, %s1233_s10  ;;  %p1241_p11 = scmp.lt.u32.totalorder %s1233_s10, %s1586_s9 }
 0x3fc   : > { %p1235_p6 = pnand %p1234_p13, %p1649_p0 }
 0x3fd   : > { %p1240_p8 = por %p1239_p5, %p1238_p4 }
 0x3fe   : > { %p1236_p10 = pneg %p1235_p6 }
 0x3ff   : > { %p1242_p2 = por %p1241_p11, %p1240_p8 }
 0x401   : > { %p1243_p3 = pnand %p1242_p2, %p1236_p10 }
 0x403   : > { %1246 = shalt.err (!%p1243_p3)
}
 0x404   : > { %s1299_s7 = smov 128   ;;  %s1300_s6 = smov 8  }
 0x405   : > { %1037 = dma.vmem_to_hbm [thread:$0]  (%p1649_p0), %s1581_s17, 256, %s1586_s9, %s747_s24, %s1299_s7, %s1299_s7, %s1300_s6  }
 0x406 PF: > { %s775_s8 = sand.u32 1, %s1277_s18   ;;  %p1650_p7 = scmp.ne.s32.totalorder %s1640_s25, 0 }
 0x407   : > { %p1651_p9 = scmp.ge.s32.totalorder %s1289_s21, 2  ;;  %s776_s22 = scalar_lea.sflag [#allocation4], %s775_s8 }
 0x409   : > { %p1051_p12 = pnand %p1651_p9, %p1650_p7 }
 0x40b   : > { %1272 = dma.done.wait (!%p1051_p12), %s776_s22, 256  }
 0x40c   : > { %1274 = vsyncadd (!%p1051_p12), %s776_s22, 4294967040  ;;  %p19_p1 = scmp.ge.s32.totalorder %s1447_s29, 4   ;;  %s1652_s18 = smov %s1281_s19 }
 0x40d   : > { %s1653_s19 = smov %s1285_s20  ;;  %s1654_s20 = smov %s1463_s27 }
 0x40e   : > { %s1655_s21 = smov %s1447_s29  ;;  %21 = sbr.rel (!%p19_p1) target bundleno = 6 (0x6), region = 97 }
 0x415   :  { %781 = vsyncpa [#allocation3], 1 }
 0x416   :  { %783 = vsyncpa [#allocation3 + $0x1], 1 }
 0x417   :  { %784 = vsyncpa [#allocation6], 1 }
 0x418   :  { %785 = vsyncpa [#allocation4], 1 }
 0x419   :  { %787 = vsyncpa [#allocation4 + $0x1], 1 }

</bundles_post_ra>
